<compile_context>
chip_gen: v7x
topology: tpu7x:2x2x1
jax: 0.10.0
libtpu: 0.0.40
codegen_flags: <defaults>
</compile_context>

<pallas_src>
import functools

import jax
import jax.numpy as jnp
from jax.experimental import pallas as pl
from jax.experimental.pallas import tpu as pltpu

_LANE = 128          # vreg lane width (last dim)
_SUBLANE = 8         # vreg sublane count (second-to-last dim, f32)
_MAX_BATCH_TILE = 4096   # 4096 x 128 bf16 activations ~ 1 MiB: tiny vs. VMEM


def _round_up(n, m):
    return (n + m - 1) // m * m


def _cdiv(a, b):
    return (a + b - 1) // b


def _num_tensorcores():
    """2 on v7x (2 TensorCores / chip), 1 on v5e/v6e and anything unknown."""
    try:
        dev = jax.devices()[0]
        if dev.platform != "tpu":
            return 1
        kind = (getattr(dev, "device_kind", "") or "").lower()
        return 2 if ("v7" in kind or "tpu7" in kind or "7x" in kind) else 1
    except Exception:
        return 1


def _pick_batch_tiling(batch, n_cores):
    """Return (batch_tile, n_steps): as few / as fat grid steps as possible.

    * 1-TC chips (v5e/v6e): one step whenever the batch fits a single tile —
      grid steps are a serial loop there, so extra steps are pure ~0.35 us
      per-step overhead.
    * v7x (2 TCs): split medium/large batches into an EVEN number of
      'parallel' steps so both cores get balanced work.
    """
    if batch <= _MAX_BATCH_TILE:
        if n_cores >= 2 and batch >= 256:
            tile = _round_up(_cdiv(batch, 2), _SUBLANE)
            return tile, 2
        return batch, 1                      # block dim == full extent: no row padding
    n_steps = _cdiv(batch, _MAX_BATCH_TILE)
    if n_cores >= 2 and n_steps % 2 != 0:
        n_steps += 1                         # balance the two TensorCores
    tile = _round_up(_cdiv(batch, n_steps), _SUBLANE)
    return tile, n_steps


def _make_basenet_kernel(n_layers, compute_dtype):
    """Fused MLP forward: matmuls on the MXU (f32 accumulate), bias/ReLU on VPU in f32."""

    def kernel(*refs):
        x_ref = refs[0]
        w_refs = refs[1:1 + n_layers]
        b_ref = refs[1 + n_layers]          # (8, bias_w) f32; row i = bias of layer i
        o_ref = refs[2 + n_layers]

        b_all = b_ref[...]                  # one vreg-sized load, reused for all layers
        h = x_ref[...].astype(compute_dtype)        # bf16 cast inside the kernel
        for i in range(n_layers):
            n = w_refs[i].shape[1]          # static width (128-padded; true out_dim for last)
            y = jnp.dot(h, w_refs[i][...], preferred_element_type=jnp.float32)
            y = y + b_all[i:i + 1, :n]      # f32 bias add, broadcast over batch
            if i < n_layers - 1:
                h = jnp.maximum(y, 0.0).astype(compute_dtype)
            else:
                o_ref[...] = y.astype(o_ref.dtype)   # true-width store, no lane padding

    return kernel


def init_basenet_params(key, in_dim, out_dim, n_hidden_layers=3, hidden_dim=64):
    """Mirror torch.nn.Linear init: U(-1/sqrt(fan_in), 1/sqrt(fan_in)); W stored [in_f, out_f]."""
    dims = [in_dim] + [hidden_dim] * n_hidden_layers + [out_dim]
    params = []
    for i in range(len(dims) - 1):
        fan_in, fan_out = dims[i], dims[i + 1]
        key, kw, kb = jax.random.split(key, 3)
        bound = 1.0 / jnp.sqrt(jnp.float32(fan_in))
        w = jax.random.uniform(kw, (fan_in, fan_out), jnp.float32, -bound, bound)
        b = jax.random.uniform(kb, (1, fan_out), jnp.float32, -bound, bound)
        params.append((w, b))
    return params


def prepare_basenet_params(params, compute_dtype=jnp.bfloat16):
    """One-time packing (hoisted out of the per-call path).

    * hidden widths are zero-padded to 128 lanes (padding is numerically inert:
      zero rows/cols + zero bias -> padded lanes stay zero through ReLU);
    * the first layer's K dim stays at the true in_dim (x is passed unpadded);
    * the LAST layer keeps its true out_dim so the output is written at true width;
    * all biases are packed into a single (8, bias_w) f32 block.
    Returns (padded_weights_tuple, bias_stack).
    """
    n_layers = len(params)
    in_dim = params[0][0].shape[0]
    padded_ws = []
    k_prev = in_dim
    for li, (w, _) in enumerate(params):
        k, n = w.shape
        n_pad = n if li == n_layers - 1 else _round_up(n, _LANE)
        wp = jnp.pad(w.astype(compute_dtype), ((0, k_prev - k), (0, n_pad - n)))
        padded_ws.append(wp)
        k_prev = n_pad

    bias_w = _round_up(max(wp.shape[1] for wp in padded_ws), _LANE)
    bias_rows = _round_up(n_layers, _SUBLANE)
    b_stack = jnp.zeros((bias_rows, bias_w), jnp.float32)
    for i, (_, b) in enumerate(params):
        bf = jnp.reshape(b, (-1,)).astype(jnp.float32)
        b_stack = b_stack.at[i, :bf.shape[0]].set(bf)
    return tuple(padded_ws), b_stack


@functools.partial(jax.jit, static_argnames=("compute_dtype",))
def basenet_forward(x, padded_ws, b_stack, *, compute_dtype=jnp.bfloat16):
    """y = relu(...relu(x@W1+b1)...)@WL + bL.  x: [B, in_dim] f32 -> [B, out_dim] f32."""
    B, in_dim = x.shape
    n_layers = len(padded_ws)
    out_dim = padded_ws[-1].shape[1]
    if padded_ws[0].shape[0] != in_dim:
        raise ValueError("x feature dim does not match prepared params")

    tile, n_steps = _pick_batch_tiling(B, _num_tensorcores())
    B_pad = tile * n_steps
    x_in = x if B_pad == B else jnp.pad(x, ((0, B_pad - B), (0, 0)))  # rows only, often a no-op

    # Last block dims equal the full array extents (allowed by the (8,128) rule),
    # so neither x (in_dim lanes) nor the output (out_dim lanes) carries padding.
    in_specs = ([pl.BlockSpec((tile, in_dim), lambda i: (i, 0))]
                + [pl.BlockSpec(w.shape, lambda i: (0, 0)) for w in padded_ws]
                + [pl.BlockSpec(b_stack.shape, lambda i: (0, 0))])
    out_spec = pl.BlockSpec((tile, out_dim), lambda i: (i, 0))

    y = pl.pallas_call(
        _make_basenet_kernel(n_layers, compute_dtype),
        out_shape=jax.ShapeDtypeStruct((B_pad, out_dim), jnp.float32),
        grid_spec=pl.GridSpec(
            grid=(n_steps,),
            in_specs=in_specs,
            out_specs=out_spec,
        ),
        compiler_params=pltpu.CompilerParams(
            dimension_semantics=("parallel",)),   # megacore sharding on v7x; harmless elsewhere
    )(x_in, *padded_ws, b_stack)

    return y if B_pad == B else y[:B]


def basenet_reference(x, params, compute_dtype=jnp.float32):
    """Pure-JAX reference. With compute_dtype=bf16 it mirrors the kernel's MXU numerics
    (bf16 operands, f32 accumulation, f32 bias/ReLU). Use float32 for exact torch parity."""
    h = x.astype(jnp.float32)
    for i, (w, b) in enumerate(params):
        h = jnp.dot(h.astype(compute_dtype), w.astype(compute_dtype),
                    preferred_element_type=jnp.float32) + b.astype(jnp.float32)
        if i < len(params) - 1:
            h = jnp.maximum(h, 0.0)
    return h


if __name__ == "__main__":
    key = jax.random.PRNGKey(0)
    key, kx1, kx2 = jax.random.split(key, 3)

    in_dim, out_dim, hidden_dim = 16, 4, 64
    params = init_basenet_params(key, in_dim, out_dim,
                                 n_hidden_layers=3, hidden_dim=hidden_dim)
    padded_ws, b_stack = prepare_basenet_params(params)   # one-time packing, outside the hot path

    for batch, kx in ((8, kx1), (32, kx2)):
        x = jax.random.normal(kx, (batch, in_dim), jnp.float32)
        out = jax.block_until_ready(basenet_forward(x, padded_ws, b_stack))
        assert out.shape == (batch, out_dim)
        ref = basenet_reference(x, params, compute_dtype=jnp.bfloat16)
        assert jnp.allclose(out, ref, atol=2e-3, rtol=2e-3), f"mismatch vs reference (batch={batch})"

    print("KERNEL_OK")
</pallas_src>

<mosaic_0001>
module attributes {stable_mosaic.version = 11 : i64} {
  func.func @kernel(%arg0: i32, %arg1: memref<8x16xf32, #tpu.memory_space<vmem>>, %arg2: memref<16x128xbf16, #tpu.memory_space<vmem>>, %arg3: memref<128x128xbf16, #tpu.memory_space<vmem>>, %arg4: memref<128x128xbf16, #tpu.memory_space<vmem>>, %arg5: memref<128x4xbf16, #tpu.memory_space<vmem>>, %arg6: memref<8x128xf32, #tpu.memory_space<vmem>>, %arg7: memref<8x4xf32, #tpu.memory_space<vmem>>) attributes {dimension_semantics = [#tpu.dimension_semantics<parallel>], iteration_bounds = array<i64: 1>, scalar_prefetch = 0 : i64, scratch_operands = 0 : i64, tpu.core_type = #tpu.core_type<tc>, window_params = [{transform_indices = @transform_0, window_bounds = array<i64: 8, 16>}, {pipeline_mode = #tpu.pipeline_mode<synchronous>, transform_indices = @transform_1, window_bounds = array<i64: 16, 128>}, {pipeline_mode = #tpu.pipeline_mode<synchronous>, transform_indices = @transform_2, window_bounds = array<i64: 128, 128>}, {pipeline_mode = #tpu.pipeline_mode<synchronous>, transform_indices = @transform_3, window_bounds = array<i64: 128, 128>}, {pipeline_mode = #tpu.pipeline_mode<synchronous>, transform_indices = @transform_4, window_bounds = array<i64: 128, 4>}, {pipeline_mode = #tpu.pipeline_mode<synchronous>, transform_indices = @transform_5, window_bounds = array<i64: 8, 128>}, {transform_indices = @transform_6, window_bounds = array<i64: 8, 4>}]} {
    %c0 = arith.constant 0 : index
    %c0_0 = arith.constant 0 : index
    %0 = vector.load %arg6[%c0, %c0_0] : memref<8x128xf32, #tpu.memory_space<vmem>>, vector<8x128xf32>
    %c0_1 = arith.constant 0 : index
    %c0_2 = arith.constant 0 : index
    %1 = vector.load %arg1[%c0_1, %c0_2] : memref<8x16xf32, #tpu.memory_space<vmem>>, vector<8x16xf32>
    %2 = arith.truncf %1 : vector<8x16xf32> to vector<8x16xbf16>
    %c0_3 = arith.constant 0 : index
    %c0_4 = arith.constant 0 : index
    %3 = vector.load %arg2[%c0_3, %c0_4] : memref<16x128xbf16, #tpu.memory_space<vmem>>, vector<16x128xbf16>
    %cst = arith.constant dense<0.000000e+00> : vector<8x128xf32>
    %4 = tpu.matmul %2, %3, %cst {dimension_numbers = #tpu.dot_dimension_numbers<[1], [0], [0], [1], [0, 0, 1, 1], [], []>} : vector<8x16xbf16>, vector<16x128xbf16>, vector<8x128xf32> -> vector<8x128xf32>
    %5 = vector.extract_strided_slice %0 {offsets = [0, 0], sizes = [1, 128], strides = [1, 1]} : vector<8x128xf32> to vector<1x128xf32>
    %6 = vector.broadcast %5 : vector<1x128xf32> to vector<8x128xf32>
    %7 = arith.addf %4, %6 : vector<8x128xf32>
    %cst_5 = arith.constant 0.000000e+00 : f32
    %8 = vector.broadcast %cst_5 : f32 to vector<8x128xf32>
    %9 = arith.maximumf %7, %8 : vector<8x128xf32>
    %10 = arith.truncf %9 : vector<8x128xf32> to vector<8x128xbf16>
    %c0_6 = arith.constant 0 : index
    %c0_7 = arith.constant 0 : index
    %11 = vector.load %arg3[%c0_6, %c0_7] : memref<128x128xbf16, #tpu.memory_space<vmem>>, vector<128x128xbf16>
    %cst_8 = arith.constant dense<0.000000e+00> : vector<8x128xf32>
    %12 = tpu.matmul %10, %11, %cst_8 {dimension_numbers = #tpu.dot_dimension_numbers<[1], [0], [0], [1], [0, 0, 1, 1], [], []>} : vector<8x128xbf16>, vector<128x128xbf16>, vector<8x128xf32> -> vector<8x128xf32>
    %13 = vector.extract_strided_slice %0 {offsets = [1, 0], sizes = [1, 128], strides = [1, 1]} : vector<8x128xf32> to vector<1x128xf32>
    %14 = vector.broadcast %13 : vector<1x128xf32> to vector<8x128xf32>
    %15 = arith.addf %12, %14 : vector<8x128xf32>
    %cst_9 = arith.constant 0.000000e+00 : f32
    %16 = vector.broadcast %cst_9 : f32 to vector<8x128xf32>
    %17 = arith.maximumf %15, %16 : vector<8x128xf32>
    %18 = arith.truncf %17 : vector<8x128xf32> to vector<8x128xbf16>
    %c0_10 = arith.constant 0 : index
    %c0_11 = arith.constant 0 : index
    %19 = vector.load %arg4[%c0_10, %c0_11] : memref<128x128xbf16, #tpu.memory_space<vmem>>, vector<128x128xbf16>
    %cst_12 = arith.constant dense<0.000000e+00> : vector<8x128xf32>
    %20 = tpu.matmul %18, %19, %cst_12 {dimension_numbers = #tpu.dot_dimension_numbers<[1], [0], [0], [1], [0, 0, 1, 1], [], []>} : vector<8x128xbf16>, vector<128x128xbf16>, vector<8x128xf32> -> vector<8x128xf32>
    %21 = vector.extract_strided_slice %0 {offsets = [2, 0], sizes = [1, 128], strides = [1, 1]} : vector<8x128xf32> to vector<1x128xf32>
    %22 = vector.broadcast %21 : vector<1x128xf32> to vector<8x128xf32>
    %23 = arith.addf %20, %22 : vector<8x128xf32>
    %cst_13 = arith.constant 0.000000e+00 : f32
    %24 = vector.broadcast %cst_13 : f32 to vector<8x128xf32>
    %25 = arith.maximumf %23, %24 : vector<8x128xf32>
    %26 = arith.truncf %25 : vector<8x128xf32> to vector<8x128xbf16>
    %c0_14 = arith.constant 0 : index
    %c0_15 = arith.constant 0 : index
    %27 = vector.load %arg5[%c0_14, %c0_15] : memref<128x4xbf16, #tpu.memory_space<vmem>>, vector<128x4xbf16>
    %cst_16 = arith.constant dense<0.000000e+00> : vector<8x4xf32>
    %28 = tpu.matmul %26, %27, %cst_16 {dimension_numbers = #tpu.dot_dimension_numbers<[1], [0], [0], [1], [0, 0, 1, 1], [], []>} : vector<8x128xbf16>, vector<128x4xbf16>, vector<8x4xf32> -> vector<8x4xf32>
    %29 = vector.extract_strided_slice %0 {offsets = [3, 0], sizes = [1, 4], strides = [1, 1]} : vector<8x128xf32> to vector<1x4xf32>
    %30 = vector.broadcast %29 : vector<1x4xf32> to vector<8x4xf32>
    %31 = arith.addf %28, %30 : vector<8x4xf32>
    %c0_17 = arith.constant 0 : index
    %c0_18 = arith.constant 0 : index
    %32 = vector.load %arg7[%c0_17, %c0_18] : memref<8x4xf32, #tpu.memory_space<vmem>>, vector<8x4xf32>
    tpu.vector_store %arg7[%c0_17, %c0_18], %31 {strides = array<i32>} : memref<8x4xf32, #tpu.memory_space<vmem>>, vector<8x4xf32>,
    return
  }
  func.func @transform_0(%arg0: i32) -> (i32, i32) {
    %c0_i32 = arith.constant 0 : i32
    %c0_i32_0 = arith.constant 0 : i32
    return %arg0, %c0_i32 : i32, i32
  }
  func.func @transform_1(%arg0: i32) -> (i32, i32) {
    %c0_i32 = arith.constant 0 : i32
    %c0_i32_0 = arith.constant 0 : i32
    %c0_i32_1 = arith.constant 0 : i32
    return %c0_i32, %c0_i32_0 : i32, i32
  }
  func.func @transform_2(%arg0: i32) -> (i32, i32) {
    %c0_i32 = arith.constant 0 : i32
    %c0_i32_0 = arith.constant 0 : i32
    %c0_i32_1 = arith.constant 0 : i32
    return %c0_i32, %c0_i32_0 : i32, i32
  }
  func.func @transform_3(%arg0: i32) -> (i32, i32) {
    %c0_i32 = arith.constant 0 : i32
    %c0_i32_0 = arith.constant 0 : i32
    %c0_i32_1 = arith.constant 0 : i32
    return %c0_i32, %c0_i32_0 : i32, i32
  }
  func.func @transform_4(%arg0: i32) -> (i32, i32) {
    %c0_i32 = arith.constant 0 : i32
    %c0_i32_0 = arith.constant 0 : i32
    %c0_i32_1 = arith.constant 0 : i32
    return %c0_i32, %c0_i32_0 : i32, i32
  }
  func.func @transform_5(%arg0: i32) -> (i32, i32) {
    %c0_i32 = arith.constant 0 : i32
    %c0_i32_0 = arith.constant 0 : i32
    %c0_i32_1 = arith.constant 0 : i32
    return %c0_i32, %c0_i32_0 : i32, i32
  }
  func.func @transform_6(%arg0: i32) -> (i32, i32) {
    %c0_i32 = arith.constant 0 : i32
    %c0_i32_0 = arith.constant 0 : i32
    return %arg0, %c0_i32 : i32, i32
  }
}

</mosaic_0001>

<bundles_post_ra>
// kernel: basenet_forward.1
= control target key start
LH: loop header
LB: loop body
LE: loop exit
PB: predicated region body
PF: predicated region fallthrough
CT: control target
= control target key end

     0   :  { %11 = vsyncpa [#allocation3], 0  ;;  %s810_s0 = inlined_call_operand.vmem [shape: f32[8,16], index: 0, kind: input, shape index: {}]   ;;  %s811_s1 = inlined_call_operand.hbm [shape: bf16[16,128], index: 1, kind: input, shape index: {}]   ;;  %s812_s2 = inlined_call_operand.vmem [shape: bf16[128,128], index: 2, kind: input, shape index: {}]   ;;  %s813_s3 = inlined_call_operand.hbm [shape: bf16[128,128], index: 3, kind: input, shape index: {}]   ;;  %s814_s4 = inlined_call_operand.vmem [shape: bf16[128,4], index: 4, kind: input, shape index: {}]   ;;  %s815_s5 = inlined_call_operand.vmem [shape: f32[8,128], index: 5, kind: input, shape index: {}]   ;;  %s816_s6 = inlined_call_operand.vmem [shape: f32[8,4], index: 6, kind: output, shape index: {}]  }
   0x1   :  { %12 = vsyncpa [#allocation5], 0  ;;  %s649_s21 = smov [#allocation2]   ;;  %s601_s25 = scalar_lea.hbm %s811_s1, 128 }
   0x2   :  { %s20_s22 = sshll.u32 %s649_s21, 4  ;;  %p602_p0 = scmp.ne.s32.totalorder %s811_s1, %s601_s25  ;;  %s21_s22 = int_to_ptr.vmem [resolvable:$true] %s20_s22 }
   0x3   :  { %p605_p1 = scmp.lt.u32.totalorder %s601_s25, %s811_s1 }
   0x5   :  { %p607_p2 = pnand %p605_p1, %p602_p0 }
   0x7   :  { %610 = shalt.err (!%p607_p2)
}
   0x8   :  { %s611_s30 = scalar_lea.vmem %s21_s22, 128  ;;  %p616_p4 = scmp.lt.s32.totalorder %s21_s22, %s21_s22 }
   0x9   :  { %p612_p3 = scmp.ne.s32.totalorder %s21_s22, %s611_s30  ;;  %p617_p5 = scmp.lt.s32.totalorder %s611_s30, %s611_s30 }
   0xb   :  { %p618_p6 = por %p617_p5, %p616_p4 }
   0xd   :  { %p619_p7 = pnand %p618_p6, %p612_p3 }
   0xf   :  { %622 = shalt.err (!%p619_p7)
}
  0x10   :  { %s650_s7 = smov 64   ;;  %s651_s8 = smov 4  }
  0x11   :  { %26 = dma.hbm_to_vmem [thread:$0]  %s811_s1, 128, %s21_s22, [#allocation3], %s650_s7, %s650_s7, %s651_s8  }
  0x12   :  { %s652_s11 = smov [#allocation4]   ;;  %s623_s15 = scalar_lea.hbm %s813_s3, 1024 }
  0x13   :  { %s34_s12 = sshll.u32 %s652_s11, 4  ;;  %p624_p8 = scmp.ne.s32.totalorder %s813_s3, %s623_s15  ;;  %s35_s12 = int_to_ptr.vmem [resolvable:$true] %s34_s12 }
  0x14   :  { %p627_p9 = scmp.lt.u32.totalorder %s623_s15, %s813_s3 }
  0x16   :  { %p629_p10 = pnand %p627_p9, %p624_p8 }
  0x18   :  { %632 = shalt.err (!%p629_p10)
}
  0x19   :  { %s633_s20 = scalar_lea.vmem %s35_s12, 1024  ;;  %p638_p12 = scmp.lt.s32.totalorder %s35_s12, %s35_s12 }
  0x1a   :  { %p634_p11 = scmp.ne.s32.totalorder %s35_s12, %s633_s20  ;;  %p639_p13 = scmp.lt.s32.totalorder %s633_s20, %s633_s20 }
  0x1c   :  { %p640_p0 = por %p639_p13, %p638_p12 }
  0x1e   :  { %p641_p1 = pnand %p640_p0, %p634_p11 }
  0x20   :  { %644 = shalt.err (!%p641_p1)
}
  0x21   :  { %40 = dma.hbm_to_vmem [thread:$0]  %s813_s3, 1024, %s35_s12, [#allocation5], %s650_s7, %s650_s7, %s651_s8  }
  0x22   :  { %645 = dma.done.wait [#allocation3], 128  }
  0x23   :  { %646 = vsyncadd [#allocation3], 4294967168 }
  0x24   :  { %647 = dma.done.wait [#allocation5], 1024  }
  0x25   :  { %648 = vsyncadd [#allocation5], 4294966272  ;;  %v653_v0 = vmov 0.0   ;;  %vm654_vm0 = vmmov 0   ;;  %v576_v1 = vld [vmem:[#allocation2] sm:$0xff]   ;;  %vm67_vm1 = vcmask 130048   ;;  %v57_v18 = vlaneseq }
  0x26   :  { %504 = vmatprep.subr.bf16.mxu0 %v653_v0  ;;  %506 = vmatprep.mubr.msk.bf16.mxu0 %vm654_vm0, %v653_v0  ;;  %v53_v2 = vld [vmem:[%s810_s0] sm:$0xff]  ;;  %v578_v5 = vld [vmem:[%s812_s2 + $0x8] sm:$0xff]   ;;  %v579_v6 = vld [vmem:[%s812_s2 + $0x10] sm:$0xff]   ;;  %vm441_vm2 = vcmask 31744  }
  0x27   :  { %510 = vmatprep.subr.bf16.mxu1 %v653_v0  ;;  %526 = vmatprep.mubr.msk.bf16.mxu1 %vm654_vm0, %v653_v0  ;;  %v54_v3 = vpack.c.bf16 %v53_v2, %v53_v2  ;;  %v577_v4 = vld [vmem:[%s812_s2] sm:$0xff]   ;;  %v580_v7 = vld [vmem:[%s812_s2 + $0x18] sm:$0xff]   ;;  %v582_v9 = vld [vmem:[%s812_s2 + $0x28] sm:$0xff]   ;;  %v764_v19 = vshrl.u32 %v57_v18, 7 }
  0x28   :  { %505 = vmatpush3.bf16.msra.mxu0 %v576_v1  ;;  %511 = vmatpush3.bf16.msra.mxu1 %v577_v4  ;;  %v581_v8 = vld [vmem:[%s812_s2 + $0x20] sm:$0xff]   ;;  %v583_v10 = vld [vmem:[%s812_s2 + $0x30] sm:$0xff]   ;;  %v584_v11 = vld [vmem:[%s812_s2 + $0x38] sm:$0xff]  }
  0x29   :  { %530 = vmatprep.subr.bf16.mxu0 %v653_v0  ;;  %512 = vmatprep.subr.bf16.mxu1 %v653_v0  ;;  %v585_v12 = vld [vmem:[#allocation4] sm:$0xff]   ;;  %v586_v13 = vld [vmem:[#allocation4 + $0x8] sm:$0xff]   ;;  %v587_v14 = vld [vmem:[#allocation4 + $0x10] sm:$0xff]   ;;  %v59_v20 = vsub.s32 0, %v764_v19  ;;  %v131_v38 = vsub.s32 1, %v764_v19  ;;  %v241_v49 = vsub.s32 2, %v764_v19 }
  0x2a   :  { %v588_v15 = vld [vmem:[#allocation4 + $0x18] sm:$0xff]   ;;  %v589_v16 = vld [vmem:[#allocation4 + $0x20] sm:$0xff]   ;;  %v590_v17 = vld [vmem:[#allocation4 + $0x28] sm:$0xff]   ;;  %v351_v58 = vsub.s32 3, %v764_v19 }
  0x2b   :  { %507 = vmatmul.mubr.msk.bf16.vlgmr.msra.gmra.mrb[0].mxu0 %vm67_vm1, %v54_v3  ;;  %v52_v21 = vld [vmem:[%s815_s5] sm:$0xff]  ;;  %v591_v30 = vld [vmem:[#allocation4 + $0x30] sm:$0xff]   ;;  %v594_v33 = vld [vmem:[%s814_s4 + $0x8] sm:$0xff]  }
  0x2c   :  { %546 = vmatprep.mubr.msk.bf16.mxu0 %vm654_vm0, %v653_v0  ;;  %513 = vmatpush3.bf16.msra.mxu1 %v578_v5  ;;  %v60_v22 = vrot.slane %v52_v21, %v59_v20  ;;  %v592_v31 = vld [vmem:[#allocation4 + $0x38] sm:$0xff]   ;;  %v595_v34 = vld [vmem:[%s814_s4 + $0x10] sm:$0xff]   ;;  %v596_v35 = vld [vmem:[%s814_s4 + $0x18] sm:$0xff]   ;;  %v132_v39 = vrot.slane %v52_v21, %v131_v38  ;;  %v242_v50 = vrot.slane %v52_v21, %v241_v49 }
  0x2d   :  { %514 = vmatprep.subr.bf16.mxu1 %v653_v0  ;;  %531 = vmatpush3.bf16.msra.mxu0 %v585_v12  ;;  %v593_v32 = vld [vmem:[%s814_s4] sm:$0xff]   ;;  %v598_v37 = vld [vmem:[%s814_s4 + $0x28] sm:$0xff]   ;;  %v599_v47 = vld [vmem:[%s814_s4 + $0x30] sm:$0xff]   ;;  %v352_v59 = vrot.slane %v52_v21, %v351_v58 }
  0x2e   :  { %532 = vmatprep.subr.bf16.mxu0 %v653_v0  ;;  %v597_v36 = vld [vmem:[%s814_s4 + $0x20] sm:$0xff]   ;;  %v600_v48 = vld [vmem:[%s814_s4 + $0x38] sm:$0xff]  }
  0x30   :  { %515 = vmatpush3.bf16.msra.mxu1 %v579_v6 }
  0x31   :  { %516 = vmatprep.subr.bf16.mxu1 %v653_v0  ;;  %533 = vmatpush3.bf16.msra.mxu0 %v586_v13 }
  0x32   :  { %534 = vmatprep.subr.bf16.mxu0 %v653_v0 }
  0x34   :  { %517 = vmatpush3.bf16.msra.mxu1 %v580_v7 }
  0x35   :  { %518 = vmatprep.subr.bf16.mxu1 %v653_v0  ;;  %535 = vmatpush3.bf16.msra.mxu0 %v587_v14 }
  0x36   :  { %536 = vmatprep.subr.bf16.mxu0 %v653_v0 }
  0x38   :  { %519 = vmatpush3.bf16.msra.mxu1 %v581_v8 }
  0x39   :  { %520 = vmatprep.subr.bf16.mxu1 %v653_v0  ;;  %537 = vmatpush3.bf16.msra.mxu0 %v588_v15 }
  0x3a   :  { %538 = vmatprep.subr.bf16.mxu0 %v653_v0 }
  0x3c   :  { %521 = vmatpush3.bf16.msra.mxu1 %v582_v9 }
  0x3d   :  { %522 = vmatprep.subr.bf16.mxu1 %v653_v0  ;;  %539 = vmatpush3.bf16.msra.mxu0 %v589_v16 }
  0x3e   :  { %540 = vmatprep.subr.bf16.mxu0 %v653_v0 }
  0x40   :  { %523 = vmatpush3.bf16.msra.mxu1 %v583_v10 }
  0x41   :  { %524 = vmatprep.subr.bf16.mxu1 %v653_v0  ;;  %541 = vmatpush3.bf16.msra.mxu0 %v590_v17 }
  0x42   :  { %542 = vmatprep.subr.bf16.mxu0 %v653_v0 }
  0x44   :  { %525 = vmatpush3.bf16.msra.mxu1 %v584_v11 }
  0x45   :  { %550 = vmatprep.subr.bf16.mxu1 %v653_v0  ;;  %543 = vmatpush3.bf16.msra.mxu0 %v591_v30 }
  0x46   :  { %544 = vmatprep.subr.bf16.mxu0 %v653_v0 }
  0x49   :  { %545 = vmatpush3.bf16.msra.mxu0 %v592_v31 }
  0xfe   :  { %v105_v23 = vpop.f32.mrb[0].mxu0 }
  0xff   :  { %v106_v24 = vadd.f32 %v105_v23, %v60_v22  ;;  %v508_v25 = vpop.f32.mrb[1].mxu0 }
 0x100   :  { %v108_v26 = vpop.f32.mrb[2].mxu0 }
 0x101   :  { %v111_v27 = vmax.f32 %v106_v24, 0.0  ;;  %v509_v28 = vpop.f32.mrb[3].mxu0 }
 0x103   :  { %v112_v29 = vpack.c.bf16 %v111_v27, %v111_v27 }
 0x105   :  { %527 = vmatmul.mubr.bf16.vlgmr.msra.gmra.mrb[0].mxu1 %v112_v29 }
 0x106   :  { %566 = vmatprep.mubr.msk.bf16.mxu1 %vm654_vm0, %v653_v0  ;;  %551 = vmatpush3.bf16.msra.mxu1 %v593_v32 }
 0x107   :  { %552 = vmatprep.subr.bf16.mxu1 %v653_v0 }
 0x10a   :  { %553 = vmatpush3.bf16.msra.mxu1 %v594_v33 }
 0x10b   :  { %554 = vmatprep.subr.bf16.mxu1 %v653_v0 }
 0x10e   :  { %555 = vmatpush3.bf16.msra.mxu1 %v595_v34 }
 0x10f   :  { %556 = vmatprep.subr.bf16.mxu1 %v653_v0 }
 0x112   :  { %557 = vmatpush3.bf16.msra.mxu1 %v596_v35 }
 0x113   :  { %558 = vmatprep.subr.bf16.mxu1 %v653_v0 }
 0x116   :  { %559 = vmatpush3.bf16.msra.mxu1 %v597_v36 }
 0x117   :  { %560 = vmatprep.subr.bf16.mxu1 %v653_v0 }
 0x11a   :  { %561 = vmatpush3.bf16.msra.mxu1 %v598_v37 }
 0x11b   :  { %562 = vmatprep.subr.bf16.mxu1 %v653_v0 }
 0x11e   :  { %563 = vmatpush3.bf16.msra.mxu1 %v599_v47 }
 0x11f   :  { %564 = vmatprep.subr.bf16.mxu1 %v653_v0 }
 0x122   :  { %565 = vmatpush3.bf16.msra.mxu1 %v600_v48 }
 0x1d8   :  { %v215_v40 = vpop.f32.mrb[0].mxu1 }
 0x1d9   :  { %v216_v41 = vadd.f32 %v215_v40, %v132_v39  ;;  %v528_v42 = vpop.f32.mrb[1].mxu1 }
 0x1da   :  { %v218_v43 = vpop.f32.mrb[2].mxu1 }
 0x1db   :  { %v221_v44 = vmax.f32 %v216_v41, 0.0  ;;  %v529_v45 = vpop.f32.mrb[3].mxu1 }
 0x1dd   :  { %v222_v46 = vpack.c.bf16 %v221_v44, %v221_v44 }
 0x1df   :  { %547 = vmatmul.mubr.bf16.vlgmr.msra.gmra.mrb[4].mxu0 %v222_v46 }
 0x2b2   :  { %v325_v51 = vpop.f32.mrb[4].mxu0 }
 0x2b3   :  { %v326_v52 = vadd.f32 %v325_v51, %v242_v50  ;;  %v548_v53 = vpop.f32.mrb[5].mxu0 }
 0x2b4   :  { %v328_v54 = vpop.f32.mrb[6].mxu0 }
 0x2b5   :  { %v331_v55 = vmax.f32 %v326_v52, 0.0  ;;  %v549_v56 = vpop.f32.mrb[7].mxu0 }
 0x2b7   :  { %v332_v57 = vpack.c.bf16 %v331_v55, %v331_v55 }
 0x2b9   :  { %567 = vmatmul.mubr.bf16.vlgmr.msra.gmra.mrb[4].mxu1 %v332_v57 }
 0x38c   :  { %v435_v60 = vpop.f32.mrb[4].mxu1 }
 0x38d   :  { %v436_v61 = vadd.f32 %v435_v60, %v352_v59  ;;  %v568_v62 = vpop.f32.mrb[5].mxu1 }
 0x38e   :  { %v438_v63 = vpop.f32.mrb[6].mxu1 }
 0x38f   :  { %442 = vst.msk [vmem:[%s816_s6] sm:$0xff] %vm441_vm2, %v436_v61  ;;  %v569_v0 = vpop.f32.mrb[7].mxu1 }
 0x390   :  { %447 = vsyncpa [#allocation3], 1 }
 0x391   :  { %448 = vsyncpa [#allocation5], 1 }

</bundles_post_ra>
